<compile_context>
chip_gen: v6e
topology: v6e:2x2x1
jax: 0.10.0
libtpu: 0.0.40
codegen_flags: <defaults>
</compile_context>

<pallas_src>
import jax
import jax.numpy as jnp
from jax import lax
from jax.experimental import pallas as pl
from jax.experimental.pallas import tpu as pltpu


def _round_up(x, m):
    return ((x + m - 1) // m) * m


def _pad_to(a, shape):
    return jnp.pad(a, [(0, s - d) for d, s in zip(a.shape, shape)])


def gru_encoder_kernel(tile_len_ref,   # SMEM scalar prefetch: (num_b_tiles,) i32, max length per b tile
                       xproj_ref,      # (L_tile, B_tile, 3*Hp) precomputed input projection (+folded bias)
                       wh_ref,         # (Hp, 3*Hp) fused hidden->hidden weights [Whr|Whz|Whn]
                       bh_ref,         # (1, 3*Hp)  hidden bias (zeros | zeros | bhn)
                       len_ref,        # (B_tile, 1) i32 per-row valid lengths
                       out_ref,        # (B_tile, Hp) final hidden state
                       h_scratch):     # (B_tile, Hp) f32, persists across the L grid axis
    b = pl.program_id(0)
    l = pl.program_id(1)
    l_tile = xproj_ref.shape[0]
    hp = h_scratch.shape[1]

    @pl.when(l == 0)
    def _init():
        h_scratch[...] = jnp.zeros_like(h_scratch)

    t0 = l * l_tile
    # Number of timesteps in this tile that are below the tile's max length.
    steps = jnp.clip(tile_len_ref[b] - t0, 0, l_tile)

    @pl.when(steps > 0)
    def _run():
        lengths = len_ref[...]                       # (B_tile, 1) i32

        def step(t, h_prev):
            # Weight / bias loads stay inside the loop body: keeps the live
            # vreg set small (h is a single (8,128) f32 vreg in the carry).
            xp = xproj_ref[t].astype(jnp.float32)    # (B_tile, 3*Hp)
            wh = wh_ref[...]
            gh = jnp.dot(h_prev.astype(wh.dtype), wh,
                         preferred_element_type=jnp.float32) + bh_ref[...]
            r = jax.nn.sigmoid(xp[:, :hp] + gh[:, :hp])
            z = jax.nn.sigmoid(xp[:, hp:2 * hp] + gh[:, hp:2 * hp])
            n = jnp.tanh(xp[:, 2 * hp:] + r * gh[:, 2 * hp:])
            h_new = (1.0 - z) * n + z * h_prev
            # pack_padded_sequence semantics: freeze rows past their length.
            return jnp.where((t0 + t) < lengths, h_new, h_prev)

        h_scratch[...] = lax.fori_loop(0, steps, step, h_scratch[...])

    @pl.when(l == pl.num_programs(1) - 1)
    def _finalize():
        out_ref[...] = h_scratch[...]


def single_stroke_encoder(stroke, mask, params, *, b_tile=8, l_tile=128):
    """Pallas wrapper matching SingleStrokeEncoder.forward.

    stroke: (B, 1, L, 2) float32
    mask:   (B, 1, L, 2) float32 (or None)
    params: dict of per-gate GRU weights/biases (x-weights (2,H), h-weights (H,H), biases (1,H))
    returns (B, d_model) float32
    """
    B, _, L, _ = stroke.shape
    H = params["whr"].shape[0]

    H_pad = _round_up(H, 128)
    B_pad = _round_up(B, b_tile)
    L_tile = max(1, min(l_tile, L))
    L_pad = _round_up(L, L_tile)
    num_b_tiles = B_pad // b_tile
    num_l_tiles = L_pad // L_tile

    x = stroke[:, 0, :, :].astype(jnp.float32)                    # (B, L, 2)
    if mask is not None:
        lengths = jnp.sum(mask[:, 0, :, 0], axis=1).astype(jnp.int32)   # (B,)
    else:
        lengths = jnp.full((B,), L, dtype=jnp.int32)

    # ---- Hoisted input projection (done once by XLA, not per recurrence step) ----
    x2 = x.reshape(B * L, 2)
    proj_r = x2 @ params["wxr"] + params["bxr"] + params["bhr"]    # bxr+bhr folded
    proj_z = x2 @ params["wxz"] + params["bxz"] + params["bhz"]    # bxz+bhz folded
    proj_n = x2 @ params["wxn"] + params["bxn"]                    # bhn stays inside r*(...)
    xproj = jnp.concatenate([_pad_to(proj_r, (B * L, H_pad)),
                             _pad_to(proj_z, (B * L, H_pad)),
                             _pad_to(proj_n, (B * L, H_pad))], axis=1)   # (B*L, 3*H_pad)
    xproj = xproj.reshape(B, L, 3 * H_pad).transpose(1, 0, 2)             # (L, B, 3*H_pad)
    xproj = jnp.pad(xproj, ((0, L_pad - L), (0, B_pad - B), (0, 0)))      # (L_pad, B_pad, 3*H_pad)

    # ---- Fused, lane-padded hidden->hidden weights ----
    wh_cat = jnp.concatenate([_pad_to(params["whr"], (H_pad, H_pad)),
                              _pad_to(params["whz"], (H_pad, H_pad)),
                              _pad_to(params["whn"], (H_pad, H_pad))], axis=1)   # (H_pad, 3*H_pad)
    bh_cat = jnp.concatenate([jnp.zeros((1, H_pad), jnp.float32),
                              jnp.zeros((1, H_pad), jnp.float32),
                              _pad_to(params["bhn"], (1, H_pad))], axis=1)       # (1, 3*H_pad)

    lengths_pad = jnp.pad(lengths, (0, B_pad - B))                  # (B_pad,)
    len2d = lengths_pad.reshape(B_pad, 1)                           # (B_pad, 1) i32
    tile_max_len = lengths_pad.reshape(num_b_tiles, b_tile).max(axis=1).astype(jnp.int32)

    grid_spec = pltpu.PrefetchScalarGridSpec(
        num_scalar_prefetch=1,
        grid=(num_b_tiles, num_l_tiles),
        in_specs=[
            pl.BlockSpec((L_tile, b_tile, 3 * H_pad), lambda b, l, tml: (l, b, 0)),
            pl.BlockSpec((H_pad, 3 * H_pad), lambda b, l, tml: (0, 0)),
            pl.BlockSpec((1, 3 * H_pad), lambda b, l, tml: (0, 0)),
            pl.BlockSpec((b_tile, 1), lambda b, l, tml: (b, 0)),
        ],
        out_specs=pl.BlockSpec((b_tile, H_pad), lambda b, l, tml: (b, 0)),
        scratch_shapes=[pltpu.VMEM((b_tile, H_pad), jnp.float32)],
    )

    out_pad = pl.pallas_call(
        gru_encoder_kernel,
        out_shape=jax.ShapeDtypeStruct((B_pad, H_pad), jnp.float32),
        grid_spec=grid_spec,
        compiler_params=pltpu.CompilerParams(
            dimension_semantics=("parallel", "arbitrary")),
    )(tile_max_len, xproj, wh_cat, bh_cat, len2d)

    return out_pad[:B, :H]


def init_gru_params(key, d_model):
    """Deterministic GRU(2, d_model) parameter init (PyTorch-style uniform)."""
    H = d_model
    bound = 1.0 / jnp.sqrt(jnp.float32(H))
    keys = jax.random.split(key, 12)
    u = lambda k, shape: jax.random.uniform(k, shape, jnp.float32, -bound, bound)
    return {
        # input->hidden, transposed to (2, H)
        "wxr": u(keys[0], (2, H)), "wxz": u(keys[1], (2, H)), "wxn": u(keys[2], (2, H)),
        # hidden->hidden, transposed to (H, H)
        "whr": u(keys[3], (H, H)), "whz": u(keys[4], (H, H)), "whn": u(keys[5], (H, H)),
        # biases, kept 2-D (1, H) for clean TPU layout
        "bxr": u(keys[6], (1, H)), "bxz": u(keys[7], (1, H)), "bxn": u(keys[8], (1, H)),
        "bhr": u(keys[9], (1, H)), "bhz": u(keys[10], (1, H)), "bhn": u(keys[11], (1, H)),
    }


def gru_reference(stroke, mask, params):
    """Pure-JAX reference of the masked GRU (pack_padded semantics)."""
    x = stroke[:, 0, :, :]                     # (B, L, 2)
    m = mask[:, 0, :, 0].astype(jnp.float32)   # (B, L)
    lengths = jnp.sum(m, axis=1)               # (B,)
    B, L, _ = x.shape
    H = params["whr"].shape[0]
    h = jnp.zeros((B, H), jnp.float32)
    for t in range(L):
        x_t = x[:, t, :]
        r = jax.nn.sigmoid(x_t @ params["wxr"] + params["bxr"] + h @ params["whr"] + params["bhr"])
        z = jax.nn.sigmoid(x_t @ params["wxz"] + params["bxz"] + h @ params["whz"] + params["bhz"])
        n = jnp.tanh(x_t @ params["wxn"] + params["bxn"] + r * (h @ params["whn"] + params["bhn"]))
        h_new = (1.0 - z) * n + z * h
        valid = (t < lengths)[:, None]
        h = jnp.where(valid, h_new, h)
    return h


if __name__ == "__main__":
    B, L, D_MODEL = 2, 8, 32

    key = jax.random.PRNGKey(0)
    k_param, k_stroke = jax.random.split(key)

    params = init_gru_params(k_param, D_MODEL)

    stroke = jax.random.normal(k_stroke, (B, 1, L, 2), dtype=jnp.float32)

    # Variable-length sequences: lengths = [8, 5].
    lengths = jnp.array([8, 5], dtype=jnp.int32)
    t_idx = jnp.arange(L)[None, :]                              # (1, L)
    mask2d = (t_idx < lengths[:, None]).astype(jnp.float32)     # (B, L)
    mask = jnp.broadcast_to(mask2d[:, None, :, None], (B, 1, L, 2))

    out = single_stroke_encoder(stroke, mask, params)
    out = jax.block_until_ready(out)

    ref = gru_reference(stroke, mask, params)
    assert out.shape == (B, D_MODEL)
    assert jnp.allclose(out, ref, atol=1e-4, rtol=1e-4), "mismatch vs reference GRU"

    print("KERNEL_OK")
</pallas_src>

<mosaic_0001>
module attributes {stable_mosaic.version = 11 : i64} {
  func.func @gru_encoder_kernel(%arg0: i32, %arg1: i32, %arg2: memref<1xi32, #tpu.memory_space<smem>>, %arg3: memref<8x8x384xf32, #tpu.memory_space<vmem>>, %arg4: memref<128x384xf32, #tpu.memory_space<vmem>>, %arg5: memref<1x384xf32, #tpu.memory_space<vmem>>, %arg6: memref<8x1xi32, #tpu.memory_space<vmem>>, %arg7: memref<8x128xf32, #tpu.memory_space<vmem>>, %arg8: memref<8x128xf32, #tpu.memory_space<vmem>>) attributes {dimension_semantics = [#tpu.dimension_semantics<parallel>, #tpu.dimension_semantics<arbitrary>], iteration_bounds = array<i64: 1, 1>, scalar_prefetch = 1 : i64, scratch_operands = 1 : i64, tpu.core_type = #tpu.core_type<tc>, window_params = [{transform_indices = @transform_0, window_bounds = array<i64: 8, 8, 384>}, {pipeline_mode = #tpu.pipeline_mode<synchronous>, transform_indices = @transform_1, window_bounds = array<i64: 128, 384>}, {pipeline_mode = #tpu.pipeline_mode<synchronous>, transform_indices = @transform_2, window_bounds = array<i64: 1, 384>}, {transform_indices = @transform_3, window_bounds = array<i64: 8, 1>}, {transform_indices = @transform_4, window_bounds = array<i64: 8, 128>}]} {
    %c0_i32 = arith.constant 0 : i32
    %0 = arith.cmpi eq, %arg1, %c0_i32 : i32
    %1 = arith.extui %0 : i1 to i32
    %c0_i32_0 = arith.constant 0 : i32
    %2 = arith.cmpi ne, %1, %c0_i32_0 : i32
    scf.if %2 {
      %cst = arith.constant 0.000000e+00 : f32
      %15 = vector.broadcast %cst : f32 to vector<8x128xf32>
      %c0 = arith.constant 0 : index
      %c0_7 = arith.constant 0 : index
      %16 = vector.load %arg8[%c0, %c0_7] : memref<8x128xf32, #tpu.memory_space<vmem>>, vector<8x128xf32>
      tpu.vector_store %arg8[%c0, %c0_7], %15 {strides = array<i32>} : memref<8x128xf32, #tpu.memory_space<vmem>>, vector<8x128xf32>,
    } else {
    }
    %c8_i32 = arith.constant 8 : i32
    %3 = arith.muli %arg1, %c8_i32 : i32
    %4 = arith.index_cast %arg0 : i32 to index
    %5 = memref.load %arg2[%4] : memref<1xi32, #tpu.memory_space<smem>>
    %6 = arith.subi %5, %3 : i32
    %c0_i32_1 = arith.constant 0 : i32
    %c8_i32_2 = arith.constant 8 : i32
    %7 = arith.maxsi %c0_i32_1, %6 : i32
    %8 = arith.minsi %c8_i32_2, %7 : i32
    %c0_i32_3 = arith.constant 0 : i32
    %9 = arith.cmpi sgt, %8, %c0_i32_3 : i32
    %10 = arith.extui %9 : i1 to i32
    %c0_i32_4 = arith.constant 0 : i32
    %11 = arith.cmpi ne, %10, %c0_i32_4 : i32
    scf.if %11 {
      %c0 = arith.constant 0 : index
      %c0_7 = arith.constant 0 : index
      %15 = vector.load %arg6[%c0, %c0_7] : memref<8x1xi32, #tpu.memory_space<vmem>>, vector<8x1xi32>
      %c0_8 = arith.constant 0 : index
      %c0_9 = arith.constant 0 : index
      %16 = vector.load %arg8[%c0_8, %c0_9] : memref<8x128xf32, #tpu.memory_space<vmem>>, vector<8x128xf32>
      %c0_i32_10 = arith.constant 0 : i32
      %17 = arith.subi %8, %c0_i32_10 : i32
      %18 = arith.addi %c0_i32_10, %17 : i32
      %c1_i32 = arith.constant 1 : i32
      %19 = scf.for %arg9 = %c0_i32_10 to %18 step %c1_i32 iter_args(%arg10 = %16) -> (vector<8x128xf32>)  : i32 {
        %21 = arith.index_cast %arg9 : i32 to index
        %c0_13 = arith.constant 0 : index
        %c0_14 = arith.constant 0 : index
        %22 = vector.load %arg3[%21, %c0_13, %c0_14] : memref<8x8x384xf32, #tpu.memory_space<vmem>>, vector<1x8x384xf32>
        %23 = vector.shape_cast %22 : vector<1x8x384xf32> to vector<8x384xf32>
        %c0_15 = arith.constant 0 : index
        %c0_16 = arith.constant 0 : index
        %24 = vector.load %arg4[%c0_15, %c0_16] : memref<128x384xf32, #tpu.memory_space<vmem>>, vector<128x384xf32>
        %cst = arith.constant dense<0.000000e+00> : vector<8x384xf32>
        %25 = tpu.matmul %arg10, %24, %cst {dimension_numbers = #tpu.dot_dimension_numbers<[1], [0], [0], [1], [0, 0, 1, 1], [], []>} : vector<8x128xf32>, vector<128x384xf32>, vector<8x384xf32> -> vector<8x384xf32>
        %c0_17 = arith.constant 0 : index
        %c0_18 = arith.constant 0 : index
        %26 = vector.load %arg5[%c0_17, %c0_18] : memref<1x384xf32, #tpu.memory_space<vmem>>, vector<1x384xf32>
        %27 = vector.broadcast %26 : vector<1x384xf32> to vector<8x384xf32>
        %28 = arith.addf %25, %27 : vector<8x384xf32>
        %29 = vector.extract_strided_slice %23 {offsets = [0, 0], sizes = [8, 128], strides = [1, 1]} : vector<8x384xf32> to vector<8x128xf32>
        %30 = vector.extract_strided_slice %28 {offsets = [0, 0], sizes = [8, 128], strides = [1, 1]} : vector<8x384xf32> to vector<8x128xf32>
        %31 = arith.addf %29, %30 : vector<8x128xf32>
        %32 = arith.negf %31 : vector<8x128xf32>
        %33 = math.exp %32 : vector<8x128xf32>
        %cst_19 = arith.constant 1.000000e+00 : f32
        %34 = vector.broadcast %cst_19 : f32 to vector<8x128xf32>
        %35 = arith.addf %34, %33 : vector<8x128xf32>
        %36 = arith.divf %34, %35 : vector<8x128xf32>
        %37 = vector.extract_strided_slice %23 {offsets = [0, 128], sizes = [8, 128], strides = [1, 1]} : vector<8x384xf32> to vector<8x128xf32>
        %38 = vector.extract_strided_slice %28 {offsets = [0, 128], sizes = [8, 128], strides = [1, 1]} : vector<8x384xf32> to vector<8x128xf32>
        %39 = arith.addf %37, %38 : vector<8x128xf32>
        %40 = arith.negf %39 : vector<8x128xf32>
        %41 = math.exp %40 : vector<8x128xf32>
        %cst_20 = arith.constant 1.000000e+00 : f32
        %42 = vector.broadcast %cst_20 : f32 to vector<8x128xf32>
        %43 = arith.addf %42, %41 : vector<8x128xf32>
        %44 = arith.divf %42, %43 : vector<8x128xf32>
        %45 = vector.extract_strided_slice %23 {offsets = [0, 256], sizes = [8, 128], strides = [1, 1]} : vector<8x384xf32> to vector<8x128xf32>
        %46 = vector.extract_strided_slice %28 {offsets = [0, 256], sizes = [8, 128], strides = [1, 1]} : vector<8x384xf32> to vector<8x128xf32>
        %47 = arith.mulf %36, %46 : vector<8x128xf32>
        %48 = arith.addf %45, %47 : vector<8x128xf32>
        %49 = math.tanh %48 : vector<8x128xf32>
        %cst_21 = arith.constant 1.000000e+00 : f32
        %50 = vector.broadcast %cst_21 : f32 to vector<8x128xf32>
        %51 = arith.subf %50, %44 : vector<8x128xf32>
        %52 = arith.mulf %51, %49 : vector<8x128xf32>
        %53 = arith.mulf %44, %arg10 : vector<8x128xf32>
        %54 = arith.addf %52, %53 : vector<8x128xf32>
        %55 = arith.addi %3, %arg9 : i32
        %56 = vector.broadcast %55 : i32 to vector<8x1xi32>
        %57 = arith.cmpi slt, %56, %15 : vector<8x1xi32>
        %58 = vector.shape_cast %57 : vector<8x1xi1> to vector<8x1xi1>
        %59 = vector.broadcast %58 : vector<8x1xi1> to vector<8x128xi1>
        %60 = arith.select %59, %54, %arg10 : vector<8x128xi1>, vector<8x128xf32>
        scf.yield %60 : vector<8x128xf32>
      }
      %c0_11 = arith.constant 0 : index
      %c0_12 = arith.constant 0 : index
      %20 = vector.load %arg8[%c0_11, %c0_12] : memref<8x128xf32, #tpu.memory_space<vmem>>, vector<8x128xf32>
      tpu.vector_store %arg8[%c0_11, %c0_12], %19 {strides = array<i32>} : memref<8x128xf32, #tpu.memory_space<vmem>>, vector<8x128xf32>,
    } else {
    }
    %c0_i32_5 = arith.constant 0 : i32
    %12 = arith.cmpi eq, %arg1, %c0_i32_5 : i32
    %13 = arith.extui %12 : i1 to i32
    %c0_i32_6 = arith.constant 0 : i32
    %14 = arith.cmpi ne, %13, %c0_i32_6 : i32
    scf.if %14 {
      %c0 = arith.constant 0 : index
      %c0_7 = arith.constant 0 : index
      %15 = vector.load %arg8[%c0, %c0_7] : memref<8x128xf32, #tpu.memory_space<vmem>>, vector<8x128xf32>
      %c0_8 = arith.constant 0 : index
      %c0_9 = arith.constant 0 : index
      %16 = vector.load %arg7[%c0_8, %c0_9] : memref<8x128xf32, #tpu.memory_space<vmem>>, vector<8x128xf32>
      tpu.vector_store %arg7[%c0_8, %c0_9], %15 {strides = array<i32>} : memref<8x128xf32, #tpu.memory_space<vmem>>, vector<8x128xf32>,
    } else {
    }
    return
  }
  func.func @transform_0(%arg0: i32, %arg1: i32, %arg2: memref<1xi32, #tpu.memory_space<smem>>) -> (i32, i32, i32) {
    %c0_i32 = arith.constant 0 : i32
    %c0_i32_0 = arith.constant 0 : i32
    return %arg1, %arg0, %c0_i32 : i32, i32, i32
  }
  func.func @transform_1(%arg0: i32, %arg1: i32, %arg2: memref<1xi32, #tpu.memory_space<smem>>) -> (i32, i32) {
    %c0_i32 = arith.constant 0 : i32
    %c0_i32_0 = arith.constant 0 : i32
    %c0_i32_1 = arith.constant 0 : i32
    return %c0_i32, %c0_i32_0 : i32, i32
  }
  func.func @transform_2(%arg0: i32, %arg1: i32, %arg2: memref<1xi32, #tpu.memory_space<smem>>) -> (i32, i32) {
    %c0_i32 = arith.constant 0 : i32
    %c0_i32_0 = arith.constant 0 : i32
    %c0_i32_1 = arith.constant 0 : i32
    return %c0_i32, %c0_i32_0 : i32, i32
  }
  func.func @transform_3(%arg0: i32, %arg1: i32, %arg2: memref<1xi32, #tpu.memory_space<smem>>) -> (i32, i32) {
    %c0_i32 = arith.constant 0 : i32
    %c0_i32_0 = arith.constant 0 : i32
    return %arg0, %c0_i32 : i32, i32
  }
  func.func @transform_4(%arg0: i32, %arg1: i32, %arg2: memref<1xi32, #tpu.memory_space<smem>>) -> (i32, i32) {
    %c0_i32 = arith.constant 0 : i32
    %c0_i32_0 = arith.constant 0 : i32
    return %arg0, %c0_i32 : i32, i32
  }
}

</mosaic_0001>

<bundles_post_ra>
// kernel: tpu_custom_call.1
= control target key start
LH: loop header
LB: loop body
LE: loop exit
PB: predicated region body
PF: predicated region fallthrough
CT: control target
= control target key end

     0   :  { %11 = vsyncpa [#allocation6], 0  ;;  %s660_s0 = inlined_call_operand.<no memory space> [shape: s32[1], index: 0, kind: input, shape index: {}]   ;;  %s661_s1 = inlined_call_operand.hbm [shape: f32[8,8,384], index: 1, kind: input, shape index: {}]   ;;  %s662_s2 = inlined_call_operand.hbm [shape: f32[128,384], index: 2, kind: input, shape index: {}]   ;;  %s663_s3 = inlined_call_operand.vmem [shape: f32[1,384], index: 3, kind: input, shape index: {}]   ;;  %s664_s4 = inlined_call_operand.vmem [shape: s32[8,1], index: 4, kind: input, shape index: {}]   ;;  %s665_s5 = inlined_call_operand.hbm [shape: f32[8,128], index: 5, kind: output, shape index: {}]  }
   0x1   :  { %12 = vsyncpa [#allocation9], 0 }
   0x2   :  { %13 = vsyncpa [#allocation7], 0  ;;  %s546_s18 = smov [#allocation5]  }
   0x3   :  { %s19_s19 = sshll.u32 %s546_s18, 4  ;;  %s20_s19 = int_to_ptr.vmem [resolvable:$true] %s19_s19 }
   0x4   :  { %s464_s20 = scalar_lea.vmem %s20_s19, 3072  ;;  %p469_p1 = scmp.lt.s32.totalorder %s20_s19, %s20_s19 }
   0x5   :  { %p465_p0 = scmp.ne.s32.totalorder %s20_s19, %s464_s20  ;;  %p470_p2 = scmp.lt.s32.totalorder %s464_s20, %s464_s20 }
   0x7   :  { %p471_p3 = por %p470_p2, %p469_p1 }
   0x9   :  { %p472_p4 = pnand %p471_p3, %p465_p0 }
   0xb   :  { %475 = shalt.err (!%p472_p4)
}
   0xc   :  { %s547_s21 = smov 384   ;;  %s548_s22 = smov 24  }
   0xd   :  { %25 = dma.hbm_to_vmem [thread:$0]  %s661_s1, 3072, %s20_s19, [#allocation6], %s547_s21, %s547_s21, %s548_s22  }
   0xe   :  { %s549_s25 = smov [#allocation8]  }
   0xf   :  { %s31_s26 = sshll.u32 %s549_s25, 4  ;;  %s32_s26 = int_to_ptr.vmem [resolvable:$true] %s31_s26 }
  0x10   :  { %s484_s27 = scalar_lea.vmem %s32_s26, 6144  ;;  %p489_p6 = scmp.lt.s32.totalorder %s32_s26, %s32_s26 }
  0x11   :  { %p485_p5 = scmp.ne.s32.totalorder %s32_s26, %s484_s27  ;;  %p490_p7 = scmp.lt.s32.totalorder %s484_s27, %s484_s27 }
  0x13   :  { %p491_p8 = por %p490_p7, %p489_p6 }
  0x15   :  { %p492_p9 = pnand %p491_p8, %p485_p5 }
  0x17   :  { %495 = shalt.err (!%p492_p9)
}
  0x18   :  { %37 = dma.hbm_to_vmem [thread:$0]  %s662_s2, 6144, %s32_s26, [#allocation9], %s547_s21, %s547_s21, %s548_s22  }
  0x19   :  { %528 = dma.done.wait [#allocation6], 3072  }
  0x1a   :  { %529 = vsyncadd [#allocation6], 4294964224 }
  0x1b   :  { %530 = dma.done.wait [#allocation9], 6144  }
  0x1c   :  { %531 = vsyncadd [#allocation9], 4294961152  ;;  %p56_p10 = scmp.gt.s32.totalorder %s660_s0, 0  ;;  %p347_p11 = scmp.lt.s32.totalorder %s660_s0, 8  ;;  %v550_v0 = vmov 0.0  }
  0x1d   :  { %52 = vst [vmem:[#allocation2] sm:$0xff] %v550_v0 }
  0x1e   :  { %s670_s0 = smov (!%p56_p10, %s660_s0), 0 }
  0x1f   :  { %s672_s0 = smov (!%p347_p11, %s670_s0), 8 }
  0x20   :  { %p352_p12 = scmp.le.s32.totalorder %s672_s0, 0 }
  0x22   :  { %63 = sbr.rel (%p352_p12) target bundleno = 331 (0x14b), region = 33 }
  0x27   :  { %v606_v1 = vld [vmem:[%s664_s4] sm:$0xff]  ;;  %342 = sbr.rel (%p352_p12) target bundleno = 330 (0x14a), region = 58  ;;  %s612_s11 = smov (!%p352_p12), 0  }
  0x28   :  { %v65_v2 = vld [vmem:[#allocation2] sm:$0xff]  }
  0x29   :  { %v666_v3 = vmov %v65_v2 }
  0x2c LB: > { %v125_v4 = vld [vmem:[#allocation8 + $0x170] sm:$0xff]  ;;  %v124_v5 = vld [vmem:[#allocation8 + $0x168] sm:$0xff]  ;;  %v122_v6 = vld [vmem:[#allocation8 + $0x158] sm:$0xff]  ;;  %v551_v8 = vmov 0.0   ;;  %v307_v10 = vstv %s540_s11  ;;  %vm552_vm0 = vmmov 0   ;;  %v553_v13 = vmov 0   ;;  %s540_s11 = sphi %s612_s11, %s69_s11   ;;  %v536_v2 = vphi %v65_v2, %v667_v2  }
  0x2d   : > { %144 = vmatprep.subr.mxu0 %v125_v4  ;;  %v121_v7 = vld [vmem:[#allocation8 + $0x150] sm:$0xff]  ;;  %208 = vmatprep.mubr.f32.mxu0 %v551_v8  ;;  %v119_v9 = vld [vmem:[#allocation8 + $0x140] sm:$0xff]  ;;  %v118_v11 = vld [vmem:[#allocation8 + $0x138] sm:$0xff]  ;;  %vm308_vm1 = vcmp.lt.s32.totalorder %v307_v10, %v606_v1  ;;  %v129_v56 = vlaneseq  ;;  %s359_s4 = smul.u32 24, %s540_s11  ;;  %s69_s11 = sadd.s32 1, %s540_s11  }
  0x2e   : > { %145 = vmatpush1.msra.mxu0 %v124_v5  ;;  %377 = vmatprep.subr.mxu1 %v551_v8  ;;  %v116_v12 = vld [vmem:[#allocation8 + $0x128] sm:$0xff]  ;;  %v309_v14 = vsel %vm308_vm1, 1, %v553_v13  ;;  %v115_v15 = vld [vmem:[#allocation8 + $0x120] sm:$0xff]  ;;  %v113_v16 = vld [vmem:[#allocation8 + $0x110] sm:$0xff]  ;;  %p68_p13 = scmp.ge.s32.totalorder %s69_s11, %s672_s0 }
  0x2f   : > { %146 = vmatprep.subr.mxu0 %v122_v6  ;;  %409 = vmatprep.mubr.msk.f32.mxu1 %vm552_vm0, %v551_v8  ;;  %v112_v17 = vld [vmem:[#allocation8 + $0x108] sm:$0xff]  ;;  %v110_v18 = vld [vmem:[#allocation8 + $0xf8] sm:$0xff]  ;;  %v109_v19 = vld [vmem:[#allocation8 + $0xf0] sm:$0xff]  ;;  %v130_v57 = vshrl.u32 %v129_v56, 7  ;;  %s75_s14 = scalar_lea.vmem [#allocation5], %s359_s4 }
  0x30   : > { %147 = vmatpush1.msra.mxu0 %v121_v7  ;;  %445 = vset.pattern.permute.xlu0 %v553_v13  ;;  %v107_v20 = vld [vmem:[#allocation8 + $0xe0] sm:$0xff]  ;;  %v126_v21 = vld [vmem:[#allocation8 + $0x178] sm:$0xff]  ;;  %v104_v24 = vld [vmem:[#allocation8 + $0xc8] sm:$0xff] }
  0x31   : > { %148 = vmatprep.subr.mxu0 %v119_v9  ;;  %311 = vperm.xlu0 %445, %v309_v14   ;;  %v106_v22 = vld [vmem:[#allocation8 + $0xd8] sm:$0xff]  ;;  %v123_v23 = vld [vmem:[#allocation8 + $0x160] sm:$0xff]  ;;  %v120_v25 = vld [vmem:[#allocation8 + $0x148] sm:$0xff]  ;;  %v131_v58 = vsub.s32 0, %v130_v57  ;;  %v135_v61 = vsub.s32 1, %v130_v57 }
  0x32   : > { %149 = vmatpush1.msra.mxu0 %v118_v11  ;;  %378 = vmatpush3.msra.mxu1 %v126_v21  ;;  %v103_v26 = vld [vmem:[#allocation8 + $0xc0] sm:$0xff]  ;;  %v101_v27 = vld [vmem:[#allocation8 + $0xb0] sm:$0xff]  ;;  %v100_v29 = vld [vmem:[#allocation8 + $0xa8] sm:$0xff] }
  0x33   : > { %150 = vmatprep.subr.mxu0 %v116_v12  ;;  %379 = vmatprep.subr.mxu1 %v551_v8  ;;  %v117_v28 = vld [vmem:[#allocation8 + $0x130] sm:$0xff]  ;;  %v98_v30 = vld [vmem:[#allocation8 + $0x98] sm:$0xff]  ;;  %v95_v33 = vld [vmem:[#allocation8 + $0x80] sm:$0xff] }
  0x34   : > { %151 = vmatpush1.msra.mxu0 %v115_v15  ;;  %380 = vmatpush3.msra.mxu1 %v123_v23  ;;  %v114_v31 = vld [vmem:[#allocation8 + $0x118] sm:$0xff]  ;;  %v97_v32 = vld [vmem:[#allocation8 + $0x90] sm:$0xff]  ;;  %v111_v34 = vld [vmem:[#allocation8 + $0x100] sm:$0xff]  ;;  %v139_v15 = vsub.s32 2, %v130_v57 }
  0x35   : > { %152 = vmatprep.subr.mxu0 %v113_v16  ;;  %381 = vmatprep.subr.mxu1 %v551_v8  ;;  %v94_v35 = vld [vmem:[#allocation8 + $0x78] sm:$0xff]  ;;  %v92_v36 = vld [vmem:[#allocation8 + $0x68] sm:$0xff]  ;;  %v91_v38 = vld [vmem:[#allocation8 + $0x60] sm:$0xff] }
  0x36   : > { %153 = vmatpush1.msra.mxu0 %v112_v17  ;;  %382 = vmatpush3.msra.mxu1 %v120_v25  ;;  %v108_v37 = vld [vmem:[#allocation8 + $0xe8] sm:$0xff]  ;;  %v89_v39 = vld [vmem:[#allocation8 + $0x50] sm:$0xff]  ;;  %v86_v42 = vld [vmem:[#allocation8 + $0x38] sm:$0xff] }
  0x37   : > { %154 = vmatprep.subr.mxu0 %v110_v18  ;;  %383 = vmatprep.subr.mxu1 %v551_v8  ;;  %v105_v40 = vld [vmem:[#allocation8 + $0xd0] sm:$0xff]  ;;  %v88_v41 = vld [vmem:[#allocation8 + $0x48] sm:$0xff]  ;;  %v102_v43 = vld [vmem:[#allocation8 + $0xb8] sm:$0xff] }
  0x38   : > { %155 = vmatpush1.msra.mxu0 %v109_v19  ;;  %384 = vmatpush3.msra.mxu1 %v117_v28  ;;  %v85_v44 = vld [vmem:[#allocation8 + $0x30] sm:$0xff]  ;;  %v83_v45 = vld [vmem:[#allocation8 + $0x20] sm:$0xff]  ;;  %v82_v47 = vld [vmem:[#allocation8 + $0x18] sm:$0xff] }
  0x39   : > { %156 = vmatprep.subr.mxu0 %v107_v20  ;;  %385 = vmatprep.subr.mxu1 %v551_v8  ;;  %v99_v46 = vld [vmem:[#allocation8 + $0xa0] sm:$0xff]  ;;  %v80_v48 = vld [vmem:[#allocation8 + $0x8] sm:$0xff]  ;;  %v93_v51 = vld [vmem:[#allocation8 + $0x70] sm:$0xff] }
  0x3a   : > { %157 = vmatpush1.msra.mxu0 %v106_v22  ;;  %386 = vmatpush3.msra.mxu1 %v114_v31  ;;  %v96_v49 = vld [vmem:[#allocation8 + $0x88] sm:$0xff]  ;;  %v79_v50 = vld [vmem:[#allocation8] sm:$0xff]  ;;  %v90_v52 = vld [vmem:[#allocation8 + $0x58] sm:$0xff] }
  0x3b   : > { %158 = vmatprep.subr.mxu0 %v104_v24  ;;  %387 = vmatprep.subr.mxu1 %v551_v8  ;;  %v87_v53 = vld [vmem:[#allocation8 + $0x40] sm:$0xff]  ;;  %v84_v54 = vld [vmem:[#allocation8 + $0x28] sm:$0xff]  ;;  %v81_v55 = vld [vmem:[#allocation8 + $0x10] sm:$0xff] }
  0x3c   : > { %159 = vmatpush1.msra.mxu0 %v103_v26  ;;  %388 = vmatpush3.msra.mxu1 %v111_v34  ;;  %v127_v59 = vld [vmem:[%s663_s3] sm:$0x7]  ;;  %v78_v21 = vld [vmem:[%s75_s14 + $0x10] sm:$0xff] }
  0x3d   : > { %160 = vmatprep.subr.mxu0 %v101_v27  ;;  %389 = vmatprep.subr.mxu1 %v551_v8  ;;  %v132_v60 = vrot.slane %v127_v59, %v131_v58  ;;  %v76_v62 = vld [vmem:[%s75_s14] sm:$0xff]  ;;  %v136_v3 = vrot.slane %v127_v59, %v135_v61  ;;  %v140_v16 = vrot.slane %v127_v59, %v139_v15 }
  0x3e   : > { %161 = vmatpush1.msra.mxu0 %v100_v29  ;;  %390 = vmatpush3.msra.mxu1 %v108_v37 }
  0x3f   : > { %162 = vmatprep.subr.mxu0 %v98_v30  ;;  %391 = vmatprep.subr.mxu1 %v551_v8 }
  0x40   : > { %163 = vmatpush1.msra.mxu0 %v97_v32  ;;  %392 = vmatpush3.msra.mxu1 %v105_v40 }
  0x41   : > { %164 = vmatprep.subr.mxu0 %v95_v33  ;;  %393 = vmatprep.subr.mxu1 %v551_v8 }
  0x42   : > { %165 = vmatpush1.msra.mxu0 %v94_v35  ;;  %394 = vmatpush3.msra.mxu1 %v102_v43 }
  0x43   : > { %166 = vmatprep.subr.mxu0 %v92_v36  ;;  %395 = vmatprep.subr.mxu1 %v551_v8 }
  0x44   : > { %167 = vmatpush1.msra.mxu0 %v91_v38  ;;  %396 = vmatpush3.msra.mxu1 %v99_v46 }
  0x45   : > { %168 = vmatprep.subr.mxu0 %v89_v39  ;;  %397 = vmatprep.subr.mxu1 %v551_v8 }
  0x46   : > { %169 = vmatpush1.msra.mxu0 %v88_v41  ;;  %398 = vmatpush3.msra.mxu1 %v96_v49 }
  0x47   : > { %170 = vmatprep.subr.mxu0 %v86_v42  ;;  %399 = vmatprep.subr.mxu1 %v551_v8 }
  0x48   : > { %171 = vmatpush1.msra.mxu0 %v85_v44  ;;  %400 = vmatpush3.msra.mxu1 %v93_v51 }
  0x49   : > { %172 = vmatprep.subr.mxu0 %v83_v45  ;;  %401 = vmatprep.subr.mxu1 %v551_v8 }
  0x4a   : > { %173 = vmatpush1.msra.mxu0 %v82_v47  ;;  %402 = vmatpush3.msra.mxu1 %v90_v52 }
  0x4b   : > { %174 = vmatprep.subr.mxu0 %v80_v48  ;;  %403 = vmatprep.subr.mxu1 %v551_v8 }
  0x4c   : > { %175 = vmatpush1.msra.mxu0 %v79_v50  ;;  %404 = vmatpush3.msra.mxu1 %v87_v53 }
  0x4d   : > { %209 = vmatmul.mubr.f32.vlgmr.msra.gmra.mxu0 %v536_v2  ;;  %405 = vmatprep.subr.mxu1 %v551_v8 }
  0x4e   : > { %406 = vmatpush3.msra.mxu1 %v84_v54 }
  0x4f   : > { %407 = vmatprep.subr.mxu1 %v551_v8  ;;  %v77_v8 = vld [vmem:[%s75_s14 + $0x8] sm:$0xff] }
  0x50   : > { %408 = vmatpush3.msra.mxu1 %v81_v55 }
  0x51   : > { %410 = vmatmul.mubr.f32.vlgmr.msra.gmra.mxu1 %v536_v2 }
  0xac   : > { %v312_v25 = vpop.permute.xlu0 %311 }
  0xad   : > { %vm313_vm2 = vcmp.eq.s32.totalorder %v312_v25, 1 }
 0x10d   : > { %v210_v63 = vpop.f32.mrf.mxu0 }
 0x10e   : > { %v211_v0 = vadd.f32 %v210_v63, %v132_v60 }
 0x10f   : > { %v212_v4 = vpop.f32.mrf.mxu0 }
 0x110   : > { %v285_v5 = vadd.f32 %v211_v0, %v76_v62  ;;  %v213_v7 = vadd.f32 %v212_v4, %v136_v3 }
 0x111   : > { %v281_v10 = vpop.f32.mrf.mxu1 }
 0x112   : > { %v355_v6 = vmul.f32 -1.442695, %v285_v5  ;;  %v292_v9 = vadd.f32 %v213_v7, %v77_v8  ;;  %v282_v19 = vadd.f32 %v281_v10, %v140_v16 }
 0x113   : > { %v411_v11 = vpop.f32.mrf.mxu1 }
 0x114   : > { %446 = vpow2.f32 %v355_v6  ;;  %v356_v12 = vmul.f32 -1.442695, %v292_v9 }
 0x116   : > { %448 = vpow2.f32 %v356_v12 }
 0x121   : > { %v447_v13 = vpop.eup %446 }
 0x122   : > { %v289_v14 = vadd.f32 1.0, %v447_v13 }
 0x123   : > { %v449_v17 = vpop.eup %448 }
 0x124   : > { %450 = vrcp.f32 %v289_v14  ;;  %v296_v18 = vadd.f32 1.0, %v449_v17 }
 0x126   : > { %452 = vrcp.f32 %v296_v18 }
 0x131   : > { %v451_v20 = vpop.eup %450 }
 0x132   : > { %v299_v22 = vmul.f32 %v451_v20, %v282_v19 }
 0x133   : > { %v453_v24 = vpop.eup %452 }
 0x134   : > { %v300_v23 = vadd.f32 %v299_v22, %v78_v21  ;;  %v302_v26 = vsub.f32 1.0, %v453_v24  ;;  %v304_v29 = vmul.f32 %v536_v2, %v453_v24 }
 0x136   : > { %454 = vtanh.f32 %v300_v23 }
 0x143   : > { %v455_v27 = vpop.eup %454 }
 0x144   : > { %v303_v28 = vmul.f32 %v455_v27, %v302_v26 }
 0x145   :  { %71 = sbr.rel (!%p68_p13) target bundleno = 44 (0x2c), region = 64 }
 0x146   : > { %v305_v30 = vadd.f32 %v304_v29, %v303_v28 }
 0x148   : > { %v314_v31 = vsel %vm313_vm2, %v305_v30, %v536_v2  }
 0x149   : > { %v667_v2 = vmov %v314_v31  ;;  %v668_v3 = vmov (%p68_p13), %v314_v31 }
 0x14a PF:  { %315 = vst [vmem:[#allocation2] sm:$0xff] %v544_v3  ;;  %v544_v3 = vphi %v666_v3, %v668_v3  }
 0x14b PF:  { %s554_s15 = smov [#allocation10]  }
 0x14c   :  { %s327_s16 = sshll.u32 %s554_s15, 4  ;;  %s328_s16 = int_to_ptr.vmem [resolvable:$true] %s327_s16 }
 0x14d   :  { %s496_s17 = scalar_lea.vmem %s328_s16, 128  ;;  %p501_p1 = scmp.lt.s32.totalorder %s328_s16, %s328_s16 }
 0x14e   :  { %p497_p0 = scmp.ne.s32.totalorder %s328_s16, %s496_s17  ;;  %p502_p2 = scmp.lt.s32.totalorder %s496_s17, %s496_s17 }
 0x150   :  { %p503_p3 = por %p502_p2, %p501_p1 }
 0x151   :  { %v319_v32 = vld [vmem:[#allocation2] sm:$0xff] }
 0x152   :  { %320 = vst [vmem:[#allocation10] sm:$0xff] %v319_v32  ;;  %p504_p4 = pnand %p503_p3, %p497_p0 }
 0x154   :  { %507 = shalt.err (!%p504_p4)
}
 0x155   :  { %330 = dma.vmem_to_hbm [thread:$0]  %s328_s16, 128, %s665_s5, [#allocation7]  }
 0x156   :  { %532 = dma.done.wait [#allocation7], 128  }
 0x157   :  { %533 = vsyncadd [#allocation7], 4294967168 }
 0x158   :  { %334 = vsyncpa [#allocation6], 1 }
 0x159   :  { %335 = vsyncpa [#allocation9], 1 }
 0x15a   :  { %336 = vsyncpa [#allocation7], 1 }

</bundles_post_ra>
